<compile_context>
chip_gen: v6e
topology: v6e:2x2x1
jax: 0.10.0
libtpu: 0.0.40
codegen_flags: <defaults>
</compile_context>

<pallas_src>
import functools

import jax
import jax.numpy as jnp
from jax.experimental import pallas as pl
from jax.experimental.pallas import tpu as pltpu

LANE = 128          # TPU lane width
SUB = 8             # TPU sublane width
NEG_PAD = -1e30     # finite "-inf" for padded vocab lanes (0 * -1e30 = 0, no NaN)


def _round_up(x, m):
    return (x + m - 1) // m * m


def _choose_tile(n_rows, tm_max):
    """Pick the largest row tile <= tm_max, but guarantee >= 2 grid tiles so
    both v7x TensorCores get work (no-op cost on single-TC v5e/v6e)."""
    tm = min(tm_max, _round_up(n_rows, SUB))
    if _round_up(n_rows, tm) // tm < 2 and n_rows > SUB:
        tm = _round_up((n_rows + 1) // 2, SUB)
    n_pad = _round_up(n_rows, tm)
    return tm, n_pad, n_pad // tm


def _gather_logits(idx_ref, emb_ref):
    """Embedding lookup as one-hot(idx) @ table on the MXU (exact for f32)."""
    tm = idx_ref.shape[0]
    vp = emb_ref.shape[0]
    lane = jax.lax.broadcasted_iota(jnp.int32, (tm, vp), 1)
    onehot = (lane == idx_ref[...]).astype(jnp.float32)            # (tm, Vp)
    return jnp.dot(onehot, emb_ref[...],
                   preferred_element_type=jnp.float32,
                   precision=jax.lax.Precision.HIGHEST)            # (tm, Lp)


def _row_losses(logits, tgt_ref, tile_row0, n_rows):
    """Per-row cross entropy; rows beyond n_rows (flat-axis padding) -> 0.
    Padded vocab lanes already hold NEG_PAD from the table, so no lane mask
    is needed before the logsumexp."""
    tm, lp = logits.shape
    m = jnp.max(logits, axis=-1, keepdims=True)
    lse = jnp.log(jnp.sum(jnp.exp(logits - m), axis=-1, keepdims=True)) + m

    lane = jax.lax.broadcasted_iota(jnp.int32, (tm, lp), 1)
    tgt_onehot = (lane == tgt_ref[...]).astype(jnp.float32)
    tgt_logit = jnp.sum(tgt_onehot * logits, axis=-1, keepdims=True)

    row = jax.lax.broadcasted_iota(jnp.int32, (tm, 1), 0)
    valid = (tile_row0 + row) < n_rows
    return jnp.where(valid, lse - tgt_logit, 0.0)                  # (tm, 1)


def bigram_logits_kernel(idx_ref, emb_ref, logits_ref):
    # Inference path: pure gather + lane-dense store, no loss work.
    logits_ref[...] = _gather_logits(idx_ref, emb_ref)


def bigram_loss_logits_kernel(idx_ref, tgt_ref, emb_ref, logits_ref, part_ref,
                              *, n_rows):
    i = pl.program_id(0)
    tm = idx_ref.shape[0]
    logits = _gather_logits(idx_ref, emb_ref)
    logits_ref[...] = logits
    row_loss = _row_losses(logits, tgt_ref, i * tm, n_rows)
    # Per-tile partial sum broadcast into a lane-dense (8, 128) block so the
    # grid axis stays fully parallel; reduced densely in the wrapper.
    part_ref[...] = jnp.zeros(part_ref.shape, jnp.float32) + jnp.sum(row_loss)


def bigram_loss_only_kernel(idx_ref, tgt_ref, emb_ref, part_ref, *, n_rows):
    # Loss-only path: no (N, 128) logits writeback -> ~99% less HBM traffic.
    i = pl.program_id(0)
    tm = idx_ref.shape[0]
    logits = _gather_logits(idx_ref, emb_ref)
    row_loss = _row_losses(logits, tgt_ref, i * tm, n_rows)
    part_ref[...] = jnp.zeros(part_ref.shape, jnp.float32) + jnp.sum(row_loss)


def bigram_forward(idx, emb, targets=None, *, tm_max=2048, want_logits=True):
    """Forward pass of the bigram LM (matches the PyTorch module).

    targets is None           -> (logits (B, T, V), None)
    targets given             -> (logits (B*T, V), scalar mean cross entropy)
    targets given, no logits  -> (None, scalar loss)   [want_logits=False]
    """
    B, T = idx.shape
    V = emb.shape[0]
    N = B * T

    lp = _round_up(V, LANE)                      # lane-padded vocab
    tm, n_pad, num_tiles = _choose_tile(N, tm_max)

    # Table padded to (lp, lp); out-of-vocab entries hold NEG_PAD so padded
    # output lanes are pre-masked (padded contraction rows hit 0 in one-hot).
    emb_p = jnp.full((lp, lp), NEG_PAD, dtype=jnp.float32)
    emb_p = emb_p.at[:V, :V].set(emb.astype(jnp.float32))
    idx_p = jnp.pad(idx.reshape(-1).astype(jnp.int32),
                    (0, n_pad - N)).reshape(n_pad, 1)

    emb_spec = pl.BlockSpec((lp, lp), lambda i: (0, 0))
    row_spec = pl.BlockSpec((tm, 1), lambda i: (i, 0))
    logit_spec = pl.BlockSpec((tm, lp), lambda i: (i, 0))
    part_spec = pl.BlockSpec((SUB, LANE), lambda i: (i, 0))
    cparams = pltpu.CompilerParams(dimension_semantics=("parallel",))

    if targets is None:
        logits_p = pl.pallas_call(
            bigram_logits_kernel,
            out_shape=jax.ShapeDtypeStruct((n_pad, lp), jnp.float32),
            grid_spec=pltpu.PrefetchScalarGridSpec(
                num_scalar_prefetch=0,
                grid=(num_tiles,),
                in_specs=[row_spec, emb_spec],
                out_specs=logit_spec),
            compiler_params=cparams,
        )(idx_p, emb_p)
        # NOTE: the [:N, :V] slice is one extra XLA copy, kept only to honor
        # the module's (B, T, V) return contract; use want_logits=False on
        # the training path when logits aren't consumed.
        return logits_p[:N, :V].reshape(B, T, V), None

    tgt_p = jnp.pad(targets.reshape(-1).astype(jnp.int32),
                    (0, n_pad - N)).reshape(n_pad, 1)

    if not want_logits:
        kernel = functools.partial(bigram_loss_only_kernel, n_rows=N)
        partials = pl.pallas_call(
            kernel,
            out_shape=jax.ShapeDtypeStruct((num_tiles * SUB, LANE),
                                           jnp.float32),
            grid_spec=pltpu.PrefetchScalarGridSpec(
                num_scalar_prefetch=0,
                grid=(num_tiles,),
                in_specs=[row_spec, row_spec, emb_spec],
                out_specs=part_spec),
            compiler_params=cparams,
        )(idx_p, tgt_p, emb_p)
        loss = jnp.sum(partials) / jnp.float32(SUB * LANE) / jnp.float32(N)
        return None, loss

    kernel = functools.partial(bigram_loss_logits_kernel, n_rows=N)
    logits_p, partials = pl.pallas_call(
        kernel,
        out_shape=(jax.ShapeDtypeStruct((n_pad, lp), jnp.float32),
                   jax.ShapeDtypeStruct((num_tiles * SUB, LANE), jnp.float32)),
        grid_spec=pltpu.PrefetchScalarGridSpec(
            num_scalar_prefetch=0,
            grid=(num_tiles,),
            in_specs=[row_spec, row_spec, emb_spec],
            out_specs=(logit_spec, part_spec)),
        compiler_params=cparams,
    )(idx_p, tgt_p, emb_p)

    logits = logits_p[:N, :V]
    # Every element of each (8,128) block holds the tile's partial sum; a
    # dense sum avoids a strided wrapper gather and is exact after rescale.
    loss = jnp.sum(partials) / jnp.float32(SUB * LANE) / jnp.float32(N)
    return logits, loss


def _ref_forward(idx, emb, targets):
    logits = emb[idx.reshape(-1)]
    lse = jax.nn.logsumexp(logits, axis=-1)
    tgt = jnp.take_along_axis(logits, targets.reshape(-1, 1), axis=-1)[:, 0]
    return logits, jnp.mean(lse - tgt)


if __name__ == "__main__":
    vocab_size = 65                       # e.g. Shakespeare char vocab
    key = jax.random.PRNGKey(0)
    k_emb, k_idx, k_tgt = jax.random.split(key, 3)

    # nn.Embedding(vocab_size, vocab_size) initializes weights ~ N(0, 1).
    emb_table = jax.random.normal(k_emb, (vocab_size, vocab_size),
                                  dtype=jnp.float32)

    # --- small case (B=2, T=8), matches the module's typical usage ---------
    B, T = 2, 8
    idx = jax.random.randint(k_idx, (B, T), 0, vocab_size, dtype=jnp.int32)
    targets = jax.random.randint(k_tgt, (B, T), 0, vocab_size,
                                 dtype=jnp.int32)

    logits, loss = bigram_forward(idx, emb_table, targets)
    logits = jax.block_until_ready(logits)
    loss = jax.block_until_ready(loss)

    ref_logits, ref_loss = _ref_forward(idx, emb_table, targets)
    assert logits.shape == (B * T, vocab_size)
    assert jnp.allclose(logits, ref_logits, rtol=1e-5, atol=1e-5)
    assert jnp.allclose(loss, ref_loss, rtol=1e-5, atol=1e-5)

    # Loss-only training path (no logits writeback).
    none_logits, loss_only = bigram_forward(idx, emb_table, targets,
                                            want_logits=False)
    jax.block_until_ready(loss_only)
    assert none_logits is None
    assert jnp.allclose(loss_only, ref_loss, rtol=1e-5, atol=1e-5)

    # Inference path (targets=None): logits only, shaped (B, T, V).
    logits_nt, loss_nt = bigram_forward(idx, emb_table, None)
    jax.block_until_ready(logits_nt)
    assert logits_nt.shape == (B, T, vocab_size)
    assert loss_nt is None
    assert jnp.allclose(logits_nt.reshape(B * T, vocab_size), ref_logits,
                        rtol=1e-5, atol=1e-5)

    # --- multi-tile + row-padding case (exercises masking & parallel grid) -
    B2, T2 = 3, 100                       # N=300 -> tm=128, 3 tiles, 84 pad rows
    k_idx2, k_tgt2 = jax.random.split(jax.random.PRNGKey(1))
    idx2 = jax.random.randint(k_idx2, (B2, T2), 0, vocab_size,
                              dtype=jnp.int32)
    tgt2 = jax.random.randint(k_tgt2, (B2, T2), 0, vocab_size,
                              dtype=jnp.int32)

    logits2, loss2 = bigram_forward(idx2, emb_table, tgt2, tm_max=128)
    jax.block_until_ready(loss2)
    ref_logits2, ref_loss2 = _ref_forward(idx2, emb_table, tgt2)
    assert jnp.allclose(logits2, ref_logits2, rtol=1e-5, atol=1e-5)
    assert jnp.allclose(loss2, ref_loss2, rtol=1e-5, atol=1e-5)

    _, loss2_only = bigram_forward(idx2, emb_table, tgt2, tm_max=128,
                                   want_logits=False)
    jax.block_until_ready(loss2_only)
    assert jnp.allclose(loss2_only, ref_loss2, rtol=1e-5, atol=1e-5)

    print("KERNEL_OK")
</pallas_src>

<mosaic_0001>
module attributes {stable_mosaic.version = 11 : i64} {
  func.func @bigram_loss_logits_kernel(%arg0: i32, %arg1: memref<8x1xi32, #tpu.memory_space<vmem>>, %arg2: memref<8x1xi32, #tpu.memory_space<vmem>>, %arg3: memref<128x128xf32, #tpu.memory_space<vmem>>, %arg4: memref<8x128xf32, #tpu.memory_space<vmem>>, %arg5: memref<8x128xf32, #tpu.memory_space<vmem>>) attributes {dimension_semantics = [#tpu.dimension_semantics<parallel>], iteration_bounds = array<i64: 2>, scalar_prefetch = 0 : i64, scratch_operands = 0 : i64, tpu.core_type = #tpu.core_type<tc>, window_params = [{transform_indices = @transform_0, window_bounds = array<i64: 8, 1>}, {transform_indices = @transform_1, window_bounds = array<i64: 8, 1>}, {pipeline_mode = #tpu.pipeline_mode<synchronous>, transform_indices = @transform_2, window_bounds = array<i64: 128, 128>}, {transform_indices = @transform_3, window_bounds = array<i64: 8, 128>}, {transform_indices = @transform_4, window_bounds = array<i64: 8, 128>}]} {
    %0 = tpu.iota {dimensions = array<i32: 1>} : vector<8x128xi32>
    %c0 = arith.constant 0 : index
    %c0_0 = arith.constant 0 : index
    %1 = vector.load %arg1[%c0, %c0_0] : memref<8x1xi32, #tpu.memory_space<vmem>>, vector<8x1xi32>
    %2 = vector.broadcast %1 : vector<8x1xi32> to vector<8x128xi32>
    %3 = arith.cmpi eq, %0, %2 : vector<8x128xi32>
    %4 = arith.extui %3 : vector<8x128xi1> to vector<8x128xi32>
    %5 = arith.sitofp %4 : vector<8x128xi32> to vector<8x128xf32>
    %c0_1 = arith.constant 0 : index
    %c0_2 = arith.constant 0 : index
    %6 = vector.load %arg3[%c0_1, %c0_2] : memref<128x128xf32, #tpu.memory_space<vmem>>, vector<128x128xf32>
    %cst = arith.constant dense<0.000000e+00> : vector<8x128xf32>
    %7 = tpu.matmul %5, %6, %cst {dimension_numbers = #tpu.dot_dimension_numbers<[1], [0], [0], [1], [0, 0, 1, 1], [], []>, precision = #tpu.contract_precision<fp32>} : vector<8x128xf32>, vector<128x128xf32>, vector<8x128xf32> -> vector<8x128xf32>
    %c0_3 = arith.constant 0 : index
    %c0_4 = arith.constant 0 : index
    %8 = vector.load %arg4[%c0_3, %c0_4] : memref<8x128xf32, #tpu.memory_space<vmem>>, vector<8x128xf32>
    tpu.vector_store %arg4[%c0_3, %c0_4], %7 {strides = array<i32>} : memref<8x128xf32, #tpu.memory_space<vmem>>, vector<8x128xf32>,
    %c8_i32 = arith.constant 8 : i32
    %9 = arith.muli %arg0, %c8_i32 : i32
    %cst_5 = arith.constant dense<0xFF800000> : vector<8xf32>
    %10 = vector.multi_reduction <maximumf>, %7, %cst_5 [1] : vector<8x128xf32> to vector<8xf32>
    %11 = vector.shape_cast %10 : vector<8xf32> to vector<8x1xf32>
    %12 = vector.broadcast %11 : vector<8x1xf32> to vector<8x128xf32>
    %13 = arith.subf %7, %12 : vector<8x128xf32>
    %14 = math.exp %13 : vector<8x128xf32>
    %cst_6 = arith.constant dense<0.000000e+00> : vector<8xf32>
    %15 = vector.multi_reduction <add>, %14, %cst_6 [1] : vector<8x128xf32> to vector<8xf32>
    %16 = vector.shape_cast %15 : vector<8xf32> to vector<8x1xf32>
    %17 = math.log %16 : vector<8x1xf32>
    %18 = arith.addf %17, %11 : vector<8x1xf32>
    %19 = tpu.iota {dimensions = array<i32: 1>} : vector<8x128xi32>
    %c0_7 = arith.constant 0 : index
    %c0_8 = arith.constant 0 : index
    %20 = vector.load %arg2[%c0_7, %c0_8] : memref<8x1xi32, #tpu.memory_space<vmem>>, vector<8x1xi32>
    %21 = vector.broadcast %20 : vector<8x1xi32> to vector<8x128xi32>
    %22 = arith.cmpi eq, %19, %21 : vector<8x128xi32>
    %23 = arith.extui %22 : vector<8x128xi1> to vector<8x128xi32>
    %24 = arith.sitofp %23 : vector<8x128xi32> to vector<8x128xf32>
    %25 = arith.mulf %24, %7 : vector<8x128xf32>
    %cst_9 = arith.constant dense<0.000000e+00> : vector<8xf32>
    %26 = vector.multi_reduction <add>, %25, %cst_9 [1] : vector<8x128xf32> to vector<8xf32>
    %27 = vector.shape_cast %26 : vector<8xf32> to vector<8x1xf32>
    %28 = tpu.iota {dimensions = array<i32: 0>} : vector<8x1xi32>
    %29 = vector.broadcast %9 : i32 to vector<8x1xi32>
    %30 = arith.addi %29, %28 : vector<8x1xi32>
    %c16_i32 = arith.constant 16 : i32
    %31 = vector.broadcast %c16_i32 : i32 to vector<8x1xi32>
    %32 = arith.cmpi slt, %30, %31 : vector<8x1xi32>
    %33 = arith.subf %18, %27 : vector<8x1xf32>
    %cst_10 = arith.constant 0.000000e+00 : f32
    %34 = vector.broadcast %cst_10 : f32 to vector<8x1xf32>
    %35 = arith.select %32, %33, %34 : vector<8x1xi1>, vector<8x1xf32>
    %cst_11 = arith.constant 0.000000e+00 : f32
    %36 = vector.broadcast %cst_11 : f32 to vector<8x128xf32>
    %37 = vector.shape_cast %35 : vector<8x1xf32> to vector<1x8x1xf32>
    %cst_12 = arith.constant dense<0.000000e+00> : vector<1xf32>
    %38 = vector.multi_reduction <add>, %37, %cst_12 [1, 2] : vector<1x8x1xf32> to vector<1xf32>
    %39 = vector.shape_cast %38 : vector<1xf32> to vector<1x1x1xf32>
    %40 = vector.extract %39[0, 0, 0] : f32 from vector<1x1x1xf32>
    %41 = vector.broadcast %40 : f32 to vector<8x128xf32>
    %42 = arith.addf %36, %41 : vector<8x128xf32>
    %c0_13 = arith.constant 0 : index
    %c0_14 = arith.constant 0 : index
    %43 = vector.load %arg5[%c0_13, %c0_14] : memref<8x128xf32, #tpu.memory_space<vmem>>, vector<8x128xf32>
    tpu.vector_store %arg5[%c0_13, %c0_14], %42 {strides = array<i32>} : memref<8x128xf32, #tpu.memory_space<vmem>>, vector<8x128xf32>,
    return
  }
  func.func @transform_0(%arg0: i32) -> (i32, i32) {
    %c0_i32 = arith.constant 0 : i32
    %c0_i32_0 = arith.constant 0 : i32
    return %arg0, %c0_i32 : i32, i32
  }
  func.func @transform_1(%arg0: i32) -> (i32, i32) {
    %c0_i32 = arith.constant 0 : i32
    %c0_i32_0 = arith.constant 0 : i32
    return %arg0, %c0_i32 : i32, i32
  }
  func.func @transform_2(%arg0: i32) -> (i32, i32) {
    %c0_i32 = arith.constant 0 : i32
    %c0_i32_0 = arith.constant 0 : i32
    %c0_i32_1 = arith.constant 0 : i32
    return %c0_i32, %c0_i32_0 : i32, i32
  }
  func.func @transform_3(%arg0: i32) -> (i32, i32) {
    %c0_i32 = arith.constant 0 : i32
    %c0_i32_0 = arith.constant 0 : i32
    return %arg0, %c0_i32 : i32, i32
  }
  func.func @transform_4(%arg0: i32) -> (i32, i32) {
    %c0_i32 = arith.constant 0 : i32
    %c0_i32_0 = arith.constant 0 : i32
    return %arg0, %c0_i32 : i32, i32
  }
}

</mosaic_0001>

<bundles_post_ra>
// kernel: tpu_custom_call.1
= control target key start
LH: loop header
LB: loop body
LE: loop exit
PB: predicated region body
PF: predicated region fallthrough
CT: control target
= control target key end

     0   :  { %10 = vsyncpa [#allocation3], 0  ;;  %s2184_s0 = inlined_call_operand.vmem [shape: s32[16,1], index: 0, kind: input, shape index: {}]   ;;  %s2185_s1 = inlined_call_operand.vmem [shape: s32[16,1], index: 1, kind: input, shape index: {}]   ;;  %s2186_s2 = inlined_call_operand.hbm [shape: f32[128,128], index: 2, kind: input, shape index: {}]   ;;  %s2187_s3 = inlined_call_operand.hbm [shape: f32[16,128], index: 3, kind: output, shape index: {0}]   ;;  %s2188_s4 = inlined_call_operand.hbm [shape: f32[16,128], index: 4, kind: output, shape index: {1}]  }
   0x1   :  { %11 = vsyncpa [#allocation4], 0 }
   0x2   :  { %13 = vsyncpa [#allocation4 + $0x1], 0 }
   0x3   :  { %14 = vsyncpa [#allocation7], 0 }
   0x4   :  { %16 = vsyncpa [#allocation7 + $0x1], 0  ;;  %s1651_s15 = smov 0   ;;  %s1653_s16 = smov 0  }
   0x5   :  { %s1655_s17 = smov 0   ;;  %s1657_s18 = smov 0  }
   0x6 LB: > { %s1672_s19 = sadd.s32 4294967295, %s1615_s18   ;;  %s1092_s20 = sadd.s32 4294967294, %s1615_s18   ;;  %s1615_s18 = sphi %s1657_s18, %s2196_s18   ;;  %s1611_s17 = sphi %s1655_s17, %s2195_s17   ;;  %s1607_s16 = sphi %s1653_s16, %s2194_s16   ;;  %s1603_s15 = sphi %s1651_s15, %s2193_s15  }
   0x7   : > { %s1676_s21 = sadd.s32 1, %s1615_s18   ;;  %s102_s22 = sadd.s32 1, %s1611_s17 }
   0x8   : > { %s99_s23 = ssub.s32 %s1615_s18, %s1676_s21  ;;  %p112_p0 = scmp.ne.s32.totalorder %s1611_s17, %s1607_s16 }
   0x9   : > { %p100_p1 = scmp.eq.s32.totalorder %s99_s23, 0  ;;  %p113_p2 = scmp.eq.s32.totalorder %s1672_s19, 1 }
   0xa   : > { %p118_p3 = scmp.ne.s32.totalorder %s1607_s16, %s1603_s15  ;;  %p119_p4 = scmp.eq.s32.totalorder %s1092_s20, 1 }
   0xb   : > { %s1687_s24 = scalar_select %p100_p1, %s1611_s17, %s102_s22  }
   0xc   : > { %p1689_p5 = por %p113_p2, %p112_p0  ;;  %p1693_p6 = por %p119_p4, %p118_p3 }
   0xd   : > { %p1093_p7 = scmp.ge.s32.totalorder %s1615_s18, 1  ;;  %p152_p8 = scmp.lt.s32.totalorder %s1615_s18, 3 }
   0xe   : > { %s2190_s26 = scalar_select %p1693_p6, 1, 0 }
   0xf   : > { %p1447_p9 = scmp.eq.s32.totalorder %s1672_s19, 0  ;;  %p1700_p10 = pnand %p1093_p7, %p152_p8 }
  0x10   : > { %s1617_s28 = smov [#allocation2]  }
  0x11   : > { %s164_s29 = sshll.u32 %s1617_s28, 4  ;;  %p1436_p11 = pneg %p1700_p10  ;;  %s165_s29 = int_to_ptr.vmem [resolvable:$true] %s164_s29 }
  0x12   : > { %s1506_s30 = scalar_lea.vmem %s165_s29, 2048  ;;  %p1514_p3 = scmp.lt.s32.totalorder %s165_s29, %s165_s29 }
  0x13   : > { %p1437_p12 = pnand %p1447_p9, %p1436_p11  ;;  %p1507_p0 = scmp.ne.s32.totalorder %s165_s29, %s1506_s30 }
  0x14   : > { %p1515_p4 = scmp.lt.s32.totalorder %s1506_s30, %s1506_s30 }
  0x15   : > { %p1497_p13 = pneg %p1437_p12 }
  0x16   : > { %p1516_p6 = por %p1515_p4, %p1514_p3 }
  0x17   : > { %p1509_p1 = pnand %p1507_p0, %p1497_p13 }
  0x19   : > { %p1510_p2 = pneg %p1509_p1 }
  0x1b   : > { %p1517_p7 = pnand %p1516_p6, %p1510_p2 }
  0x1d   : > { %1520 = shalt.err (!%p1517_p7)
}
  0x1e   : > { %s1618_s5 = smov 128   ;;  %s1619_s6 = smov 8  }
  0x1f   : > { %1439 = dma.hbm_to_vmem [thread:$0]  (!%p1437_p12), %s2186_s2, 2048, %s165_s29, [#allocation3], %s1618_s5, %s1618_s5, %s1619_s6  }
  0x20   : > { %194 = sbr.rel (%p1700_p10) target bundleno = 972 (0x3cc), region = 32 }
  0x25   : > { %1590 = dma.done.wait (%p1447_p9), [#allocation3], 2048  }
  0x26   : > { %1592 = vsyncadd (%p1447_p9), [#allocation3], 4294965248  ;;  %p228_p8 = scmp.lt.s32.totalorder %s1672_s19, 1  ;;  %v1620_v0 = vmov 0   ;;  %v1621_v1 = vmov 0.0   ;;  %vm1622_vm0 = vmmov 0  }
  0x27   : > { %1489 = vset.pattern.permute.xlu0 %v1620_v0  ;;  %1251 = vmatprep.subr.mxu1 %v1621_v1  ;;  %v260_v3 = vld [vmem:[#allocation2 + $0x78] sm:$0xff]  ;;  %v259_v4 = vld [vmem:[#allocation2 + $0x70] sm:$0xff]  ;;  %v258_v7 = vld [vmem:[#allocation2 + $0x68] sm:$0xff]  ;;  %s2109_s23 = sand.u32 1, %s1607_s16   ;;  %s1106_s29 = sshll.u32 %s1672_s19, 3  ;;  %vm931_vm4 = vcmask 7168  }
  0x28   : > { %s1720_s9 = scalar_select %p228_p8, %s1672_s19, 1  ;;  %1216 = vmatprep.subr.mxu0 %v1621_v1  ;;  %1490 = vset.pattern.permute.xlu1 %v1620_v0  ;;  %v1733_v5 = vand.u32 4294901760, %v260_v3  ;;  %v1735_v6 = vand.u32 4294901760, %v259_v4  ;;  %v257_v8 = vld [vmem:[#allocation2 + $0x60] sm:$0xff]  ;;  %v256_v9 = vld [vmem:[#allocation2 + $0x58] sm:$0xff]  ;;  %v1737_v10 = vand.u32 4294901760, %v258_v7 }
  0x29   : > { %1283 = vmatprep.mubr.msk.f32.mxu1 %vm1622_vm0, %v1621_v1  ;;  %1248 = vmatprep.mubr.msk.f32.mxu0 %vm1622_vm0, %v1621_v1  ;;  %v1739_v11 = vand.u32 4294901760, %v257_v8  ;;  %v1741_v12 = vand.u32 4294901760, %v256_v9  ;;  %v255_v13 = vld [vmem:[#allocation2 + $0x50] sm:$0xff]  ;;  %v254_v14 = vld [vmem:[#allocation2 + $0x48] sm:$0xff]  ;;  %v253_v15 = vld [vmem:[#allocation2 + $0x40] sm:$0xff]  ;;  %s1098_s27 = sshll.u32 %s2109_s23, 3 }
  0x2a   : > { %s1100_s10 = sshll.u32 %s1720_s9, 3  ;;  %v1744_v16 = vsub.f32 %v260_v3, %v1733_v5  ;;  %v1747_v17 = vsub.f32 %v259_v4, %v1735_v6  ;;  %1217 = vmatpush3.msra.mxu0 %v1733_v5  ;;  %v1750_v18 = vand.u32 4294901760, %v255_v13  ;;  %v1752_v19 = vand.u32 4294901760, %v254_v14  ;;  %v252_v36 = vld [vmem:[#allocation2 + $0x38] sm:$0xff]  ;;  %v251_v37 = vld [vmem:[#allocation2 + $0x30] sm:$0xff]  ;;  %v250_v41 = vld [vmem:[#allocation2 + $0x28] sm:$0xff] }
  0x2b   : > { %s231_s13 = scalar_lea.vmem %s2184_s0, %s1100_s10  ;;  %v1755_v20 = vsub.f32 %v258_v7, %v1737_v10  ;;  %v1758_v21 = vsub.f32 %v257_v8, %v1739_v11  ;;  %v1761_v22 = vsub.f32 %v256_v9, %v1741_v12  ;;  %1218 = vmatprep.subr.mxu0 %v1621_v1  ;;  %v1764_v23 = vand.u32 4294901760, %v253_v15  ;;  %v249_v43 = vld [vmem:[#allocation2 + $0x20] sm:$0xff]  ;;  %v248_v51 = vld [vmem:[#allocation2 + $0x18] sm:$0xff]  ;;  %v247_v57 = vld [vmem:[#allocation2 + $0x10] sm:$0xff]  ;;  %s235_s22 = scalar_lea.vmem %s2185_s1, %s1100_s10 }
  0x2c   : > { %v238_v2 = vld [vmem:[%s231_s13] sm:$0xff]  ;;  %v355_v24 = vand.u32 4294901760, %v1744_v16  ;;  %v362_v25 = vand.u32 4294901760, %v1747_v17  ;;  %v1769_v26 = vsub.f32 %v255_v13, %v1750_v18  ;;  %1219 = vmatpush3.msra.mxu0 %v1735_v6  ;;  %v1776_v29 = vsub.f32 %v254_v14, %v1752_v19  ;;  %v246_v63 = vld [vmem:[#allocation2 + $0x8] sm:$0xff]  ;;  %s2116_s28 = scalar_lea.vmem [#allocation5], %s1098_s27  ;;  %s1110_s30 = sshll.u32 %s1672_s19, 7 }
  0x2d   : > { %240 = vperm.xlu0 %1489, %v238_v2   ;;  %v369_v27 = vand.u32 4294901760, %v1755_v20  ;;  %v376_v28 = vand.u32 4294901760, %v1758_v21  ;;  %1220 = vmatprep.subr.mxu0 %v1621_v1  ;;  %v383_v32 = vand.u32 4294901760, %v1761_v22  ;;  %v1792_v35 = vsub.f32 %v253_v15, %v1764_v23  ;;  %v245_v8 = vld [vmem:[#allocation2] sm:$0xff]  ;;  %s962_s7 = scalar_lea.hbm %s2187_s3, %s1110_s30  ;;  %s964_s8 = sshll.u32 %s2116_s28, 4  ;;  %s965_s8 = int_to_ptr.vmem [resolvable:$true] %s964_s8 }
  0x2e   : > { %v356_v30 = vsub.f32 %v1744_v16, %v355_v24  ;;  %v363_v31 = vsub.f32 %v1747_v17, %v362_v25  ;;  %1221 = vmatpush3.msra.mxu0 %v1737_v10  ;;  %v390_v34 = vand.u32 4294901760, %v1769_v26  ;;  %v397_v42 = vand.u32 4294901760, %v1776_v29  ;;  %s946_s9 = scalar_lea.sflag [#allocation4], %s2109_s23  ;;  %s1521_s10 = scalar_lea.vmem %s965_s8, 128 }
  0x2f   : > { %v370_v33 = vsub.f32 %v1755_v20, %v369_v27  ;;  %1222 = vmatprep.subr.mxu0 %v1621_v1  ;;  %v377_v40 = vsub.f32 %v1758_v21, %v376_v28  ;;  %v384_v45 = vsub.f32 %v1761_v22, %v383_v32  ;;  %v1803_v46 = vand.u32 4294901760, %v252_v36  ;;  %p1522_p6 = scmp.ne.s32.totalorder %s965_s8, %s1521_s10  ;;  %s1624_s11 = smov [#allocation5]  }
  0x30   : > { %v357_v38 = vand.u32 4294901760, %v356_v30  ;;  %v364_v39 = vand.u32 4294901760, %v363_v31  ;;  %1223 = vmatpush3.msra.mxu0 %v1739_v11  ;;  %v1806_v47 = vand.u32 4294901760, %v251_v37  ;;  %v391_v48 = vsub.f32 %v1769_v26, %v390_v34  ;;  %s1525_s12 = sshll.u32 %s1624_s11, 4  ;;  %s1526_s12 = int_to_ptr.vmem [resolvable:$false] %s1525_s12 }
  0x31   : > { %1224 = vmatprep.subr.mxu0 %v1621_v1  ;;  %v371_v44 = vand.u32 4294901760, %v370_v33  ;;  %v404_v49 = vand.u32 4294901760, %v1792_v35  ;;  %v1814_v50 = vand.u32 4294901760, %v250_v41  ;;  %v378_v52 = vand.u32 4294901760, %v377_v40  ;;  %p1523_p9 = pnand %p1522_p6, %p1689_p5  ;;  %s1527_s13 = scalar_lea.vmem %s1526_s12, 256 }
  0x32   : > { %1252 = vmatpush3.msra.mxu1 %v357_v38  ;;  %1225 = vmatpush3.msra.mxu0 %v1741_v12  ;;  %v1817_v53 = vsub.f32 %v252_v36, %v1803_v46  ;;  %v1820_v54 = vsub.f32 %v251_v37, %v1806_v47  ;;  %v1823_v55 = vand.u32 4294901760, %v249_v43  ;;  %v398_v56 = vsub.f32 %v1776_v29, %v397_v42  ;;  %p1528_p11 = scmp.lt.s32.totalorder %s965_s8, %s1526_s12  ;;  %p1529_p12 = scmp.lt.s32.totalorder %s1527_s13, %s1521_s10 }
  0x33   : > { %1253 = vmatprep.subr.mxu1 %v1621_v1  ;;  %1226 = vmatprep.subr.mxu0 %v1621_v1  ;;  %v385_v58 = vand.u32 4294901760, %v384_v45  ;;  %v1832_v60 = vsub.f32 %v250_v41, %v1814_v50  ;;  %v1835_v61 = vand.u32 4294901760, %v248_v51  ;;  %v405_v62 = vsub.f32 %v1792_v35, %v404_v49  ;;  %p1524_p10 = pneg %p1523_p9 }
  0x34   : > { %1254 = vmatpush3.msra.mxu1 %v364_v39  ;;  %1227 = vmatpush3.msra.mxu0 %v1750_v18  ;;  %v411_v59 = vand.u32 4294901760, %v1817_v53  ;;  %v392_v0 = vand.u32 4294901760, %v391_v48  ;;  %v418_v2 = vand.u32 4294901760, %v1820_v54  ;;  %v1844_v3 = vsub.f32 %v249_v43, %v1823_v55  ;;  %p1530_p13 = por %p1529_p12, %p1528_p11 }
  0x35   : > { %1255 = vmatprep.subr.mxu1 %v1621_v1  ;;  %1228 = vmatprep.subr.mxu0 %v1621_v1  ;;  %v1847_v4 = vand.u32 4294901760, %v247_v57  ;;  %v399_v7 = vand.u32 4294901760, %v398_v56  ;;  %v425_v13 = vand.u32 4294901760, %v1832_v60  ;;  %v1856_v14 = vsub.f32 %v248_v51, %v1835_v61 }
  0x36   : > { %1256 = vmatpush3.msra.mxu1 %v371_v44  ;;  %1229 = vmatpush3.msra.mxu0 %v1752_v19  ;;  %v412_v9 = vsub.f32 %v1817_v53, %v411_v59  ;;  %v1859_v15 = vand.u32 4294901760, %v246_v63  ;;  %v406_v30 = vand.u32 4294901760, %v405_v62  ;;  %v419_v31 = vsub.f32 %v1820_v54, %v418_v2  ;;  %p1531_p0 = pnand %p1530_p13, %p1524_p10 }
  0x37   : > { %1257 = vmatprep.subr.mxu1 %v1621_v1  ;;  %1230 = vmatprep.subr.mxu0 %v1621_v1  ;;  %v432_v33 = vand.u32 4294901760, %v1844_v3  ;;  %v1868_v36 = vsub.f32 %v247_v57, %v1847_v4  ;;  %v1871_v37 = vand.u32 4294901760, %v245_v8  ;;  %v426_v39 = vsub.f32 %v1832_v60, %v425_v13 }
  0x38   : > { %1258 = vmatpush3.msra.mxu1 %v378_v52  ;;  %1231 = vmatpush3.msra.mxu0 %v1764_v23  ;;  %v413_v38 = vand.u32 4294901760, %v412_v9  ;;  %v439_v40 = vand.u32 4294901760, %v1856_v14  ;;  %v1880_v41 = vsub.f32 %v246_v63, %v1859_v15  ;;  %v420_v43 = vand.u32 4294901760, %v419_v31  ;;  %v914_v31 = vld [vmem:[%s235_s22] sm:$0xff] }
  0x39   : > { %1259 = vmatprep.subr.mxu1 %v1621_v1  ;;  %1232 = vmatprep.subr.mxu0 %v1621_v1  ;;  %v433_v44 = vsub.f32 %v1844_v3, %v432_v33  ;;  %v446_v45 = vand.u32 4294901760, %v1868_v36  ;;  %v1890_v48 = vsub.f32 %v245_v8, %v1871_v37  ;;  %v427_v51 = vand.u32 4294901760, %v426_v39 }
  0x3a   : > { %1260 = vmatpush3.msra.mxu1 %v385_v58  ;;  %1233 = vmatpush3.msra.mxu0 %v1803_v46  ;;  %v440_v52 = vsub.f32 %v1856_v14, %v439_v40  ;;  %v453_v56 = vand.u32 4294901760, %v1880_v41 }
  0x3b   : > { %1261 = vmatprep.subr.mxu1 %v1621_v1  ;;  %1234 = vmatprep.subr.mxu0 %v1621_v1  ;;  %v434_v57 = vand.u32 4294901760, %v433_v44  ;;  %v447_v58 = vsub.f32 %v1868_v36, %v446_v45  ;;  %v460_v62 = vand.u32 4294901760, %v1890_v48 }
  0x3c   : > { %1262 = vmatpush3.msra.mxu1 %v392_v0  ;;  %1235 = vmatpush3.msra.mxu0 %v1806_v47  ;;  %v441_v63 = vand.u32 4294901760, %v440_v52  ;;  %v454_v0 = vsub.f32 %v1880_v41, %v453_v56 }
  0x3d   : > { %1263 = vmatprep.subr.mxu1 %v1621_v1  ;;  %1236 = vmatprep.subr.mxu0 %v1621_v1  ;;  %v461_v8 = vsub.f32 %v1890_v48, %v460_v62 }
  0x3e   : > { %1264 = vmatpush3.msra.mxu1 %v399_v7  ;;  %1237 = vmatpush3.msra.mxu0 %v1814_v50  ;;  %v448_v7 = vand.u32 4294901760, %v447_v58  ;;  %v455_v9 = vand.u32 4294901760, %v454_v0 }
  0x3f   : > { %1265 = vmatprep.subr.mxu1 %v1621_v1  ;;  %1238 = vmatprep.subr.mxu0 %v1621_v1 }
  0x40   : > { %1266 = vmatpush3.msra.mxu1 %v406_v30  ;;  %1239 = vmatpush3.msra.mxu0 %v1823_v55  ;;  %v462_v30 = vand.u32 4294901760, %v461_v8 }
  0x41   : > { %1267 = vmatprep.subr.mxu1 %v1621_v1  ;;  %1240 = vmatprep.subr.mxu0 %v1621_v1 }
  0x42   : > { %1268 = vmatpush3.msra.mxu1 %v413_v38  ;;  %1241 = vmatpush3.msra.mxu0 %v1835_v61  ;;  %v236_v38 = vlaneseq }
  0x43   : > { %1269 = vmatprep.subr.mxu1 %v1621_v1  ;;  %1242 = vmatprep.subr.mxu0 %v1621_v1 }
  0x44   : > { %1270 = vmatpush3.msra.mxu1 %v420_v43  ;;  %1243 = vmatpush3.msra.mxu0 %v1847_v4  ;;  %v1931_v39 = vand.u32 127, %v236_v38 }
  0x45   : > { %1271 = vmatprep.subr.mxu1 %v1621_v1  ;;  %1244 = vmatprep.subr.mxu0 %v1621_v1 }
  0x46   : > { %1272 = vmatpush3.msra.mxu1 %v427_v51  ;;  %1245 = vmatpush3.msra.mxu0 %v1859_v15  ;;  %v1623_v51 = vmov 1.0  }
  0x47   : > { %1273 = vmatprep.subr.mxu1 %v1621_v1  ;;  %1246 = vmatprep.subr.mxu0 %v1621_v1 }
  0x48   : > { %1274 = vmatpush3.msra.mxu1 %v434_v57  ;;  %1247 = vmatpush3.msra.mxu0 %v1871_v37 }
  0x49   : > { %1275 = vmatprep.subr.mxu1 %v1621_v1  ;;  %1286 = vmatprep.subr.mxu0 %v1621_v1 }
  0x4a   : > { %1276 = vmatpush3.msra.mxu1 %v441_v63  ;;  %916 = vperm.xlu1 %1490, %v914_v31  }
  0x4b   : > { %1277 = vmatprep.subr.mxu1 %v1621_v1 }
  0x4c   : > { %1278 = vmatpush3.msra.mxu1 %v448_v7 }
  0x4d   : > { %1279 = vmatprep.subr.mxu1 %v1621_v1 }
  0x4e   : > { %1280 = vmatpush3.msra.mxu1 %v455_v9 }
  0x4f   : > { %1281 = vmatprep.subr.mxu1 %v1621_v1 }
  0x50   : > { %1282 = vmatpush3.msra.mxu1 %v462_v30 }
  0x51   : > { %1321 = vmatprep.subr.mxu1 %v1621_v1 }
  0xa8   : > { %v1933_v43 = vpop.permute.xlu0 %240 }
  0xa9   : > { %vm242_vm1 = vcmp.eq.s32.totalorder %v1931_v39, %v1933_v43 }
  0xaa   : > { %v1102_v44 = vsel %vm242_vm1, 1.0, %v1621_v1  ;;  %1284 = vmatmul.mubr.msk.f32.vlgmr.msra.gmra.mxu1 %vm242_vm1, %v1623_v51 }
  0xab   : > { %v1945_v52 = vsub.f32 %v1102_v44, %v1102_v44  ;;  %1322 = vmatpush3.msra.mxu1 %v1733_v5  ;;  %1353 = vmatprep.mubr.msk.f32.mxu1 %vm1622_vm0, %v1621_v1 }
  0xac   : > { %1323 = vmatprep.subr.mxu1 %v1621_v1 }
  0xad   : > { %1324 = vmatpush3.msra.mxu1 %v1735_v6  ;;  %v344_v57 = vand.u32 4294901760, %v1945_v52 }
  0xae   : > { %1325 = vmatprep.subr.mxu1 %v1621_v1 }
  0xaf   : > { %1326 = vmatpush3.msra.mxu1 %v1737_v10  ;;  %v345_v58 = vsub.f32 %v1945_v52, %v344_v57 }
  0xb0   : > { %1327 = vmatprep.subr.mxu1 %v1621_v1 }
  0xb1   : > { %1328 = vmatpush3.msra.mxu1 %v1739_v11  ;;  %v346_v63 = vand.u32 4294901760, %v345_v58 }
  0xb2   : > { %1329 = vmatprep.subr.mxu1 %v1621_v1 }
  0xb3   : > { %1330 = vmatpush3.msra.mxu1 %v1741_v12  ;;  %1249 = vmatmul.mubr.f32.vlgmr.msra.gmra.mxu0 %v346_v63 }
  0xb4   : > { %1287 = vmatpush3.msra.mxu0 %v1744_v16  ;;  %1331 = vmatprep.subr.mxu1 %v1621_v1 }
  0xb5   : > { %1288 = vmatprep.subr.mxu0 %v1621_v1  ;;  %1332 = vmatpush3.msra.mxu1 %v1750_v18 }
  0xb6   : > { %1289 = vmatpush3.msra.mxu0 %v1747_v17  ;;  %1333 = vmatprep.subr.mxu1 %v1621_v1 }
  0xb7   : > { %1290 = vmatprep.subr.mxu0 %v1621_v1  ;;  %1334 = vmatpush3.msra.mxu1 %v1752_v19 }
  0xb8   : > { %1291 = vmatpush3.msra.mxu0 %v1755_v20  ;;  %1335 = vmatprep.subr.mxu1 %v1621_v1 }
  0xb9   : > { %1292 = vmatprep.subr.mxu0 %v1621_v1  ;;  %1336 = vmatpush3.msra.mxu1 %v1764_v23 }
  0xba   : > { %1293 = vmatpush3.msra.mxu0 %v1758_v21  ;;  %1337 = vmatprep.subr.mxu1 %v1621_v1 }
  0xbb   : > { %1294 = vmatprep.subr.mxu0 %v1621_v1  ;;  %1338 = vmatpush3.msra.mxu1 %v1803_v46 }
  0xbc   : > { %1295 = vmatpush3.msra.mxu0 %v1761_v22  ;;  %1339 = vmatprep.subr.mxu1 %v1621_v1 }
  0xbd   : > { %1296 = vmatprep.subr.mxu0 %v1621_v1  ;;  %1340 = vmatpush3.msra.mxu1 %v1806_v47 }
  0xbe   : > { %1297 = vmatpush3.msra.mxu0 %v1769_v26  ;;  %1341 = vmatprep.subr.mxu1 %v1621_v1 }
  0xbf   : > { %1298 = vmatprep.subr.mxu0 %v1621_v1  ;;  %1342 = vmatpush3.msra.mxu1 %v1814_v50 }
  0xc0   : > { %1299 = vmatpush3.msra.mxu0 %v1776_v29  ;;  %1343 = vmatprep.subr.mxu1 %v1621_v1 }
  0xc1   : > { %1300 = vmatprep.subr.mxu0 %v1621_v1  ;;  %1344 = vmatpush3.msra.mxu1 %v1823_v55 }
  0xc2   : > { %1301 = vmatpush3.msra.mxu0 %v1792_v35  ;;  %1345 = vmatprep.subr.mxu1 %v1621_v1 }
  0xc3   : > { %1302 = vmatprep.subr.mxu0 %v1621_v1  ;;  %1346 = vmatpush3.msra.mxu1 %v1835_v61 }
  0xc4   : > { %1303 = vmatpush3.msra.mxu0 %v1817_v53  ;;  %1347 = vmatprep.subr.mxu1 %v1621_v1 }
  0xc5   : > { %1304 = vmatprep.subr.mxu0 %v1621_v1  ;;  %1348 = vmatpush3.msra.mxu1 %v1847_v4 }
  0xc6   : > { %1305 = vmatpush3.msra.mxu0 %v1820_v54  ;;  %1349 = vmatprep.subr.mxu1 %v1621_v1 }
  0xc7   : > { %1306 = vmatprep.subr.mxu0 %v1621_v1  ;;  %1350 = vmatpush3.msra.mxu1 %v1859_v15 }
  0xc8   : > { %1307 = vmatpush3.msra.mxu0 %v1832_v60  ;;  %1351 = vmatprep.subr.mxu1 %v1621_v1 }
  0xc9   : > { %1308 = vmatprep.subr.mxu0 %v1621_v1  ;;  %1352 = vmatpush3.msra.mxu1 %v1871_v37 }
  0xca   : > { %1309 = vmatpush3.msra.mxu0 %v1844_v3  ;;  %1354 = vmatmul.mubr.f32.vlgmr.msra.gmra.mxu1 %v344_v57 }
  0xcb   : > { %1391 = vmatprep.subr.mxu1 %v1621_v1  ;;  %1310 = vmatprep.subr.mxu0 %v1621_v1 }
  0xcc   : > { %1392 = vmatpush3.msra.mxu1 %v1733_v5  ;;  %1311 = vmatpush3.msra.mxu0 %v1856_v14 }
  0xcd   : > { %1393 = vmatprep.subr.mxu1 %v1621_v1  ;;  %1312 = vmatprep.subr.mxu0 %v1621_v1 }
  0xce   : > { %1394 = vmatpush3.msra.mxu1 %v1735_v6  ;;  %1313 = vmatpush3.msra.mxu0 %v1868_v36 }
  0xcf   : > { %1395 = vmatprep.subr.mxu1 %v1621_v1  ;;  %1314 = vmatprep.subr.mxu0 %v1621_v1 }
  0xd0   : > { %1396 = vmatpush3.msra.mxu1 %v1737_v10  ;;  %1315 = vmatpush3.msra.mxu0 %v1880_v41 }
  0xd1   : > { %1397 = vmatprep.subr.mxu1 %v1621_v1  ;;  %1316 = vmatprep.subr.mxu0 %v1621_v1 }
  0xd2   : > { %1398 = vmatpush3.msra.mxu1 %v1739_v11  ;;  %1317 = vmatpush3.msra.mxu0 %v1890_v48 }
  0xd3   : > { %1318 = vmatprep.mubr.msk.f32.mxu0 %vm1622_vm0, %v1621_v1  ;;  %1399 = vmatprep.subr.mxu1 %v1621_v1 }
  0xd4   : > { %1319 = vmatmul.mubr.f32.vlgmr.msra.gmra.mxu0 %v1945_v52  ;;  %1356 = vmatprep.subr.mxu0 %v1621_v1 }
  0xd5   : > { %1400 = vmatpush3.msra.mxu1 %v1741_v12  ;;  %1357 = vmatpush3.msra.mxu0 %v355_v24 }
  0xd6   : > { %1401 = vmatprep.subr.mxu1 %v1621_v1  ;;  %1358 = vmatprep.subr.mxu0 %v1621_v1 }
  0xd7   : > { %1402 = vmatpush3.msra.mxu1 %v1750_v18  ;;  %1359 = vmatpush3.msra.mxu0 %v362_v25 }
  0xd8   : > { %1403 = vmatprep.subr.mxu1 %v1621_v1  ;;  %1360 = vmatprep.subr.mxu0 %v1621_v1 }
  0xd9   : > { %1404 = vmatpush3.msra.mxu1 %v1752_v19  ;;  %1361 = vmatpush3.msra.mxu0 %v369_v27 }
  0xda   : > { %1405 = vmatprep.subr.mxu1 %v1621_v1  ;;  %1362 = vmatprep.subr.mxu0 %v1621_v1 }
  0xdb   : > { %1406 = vmatpush3.msra.mxu1 %v1764_v23  ;;  %1363 = vmatpush3.msra.mxu0 %v376_v28  ;;  %v917_v23 = vpop.permute.xlu1 %916 }
  0xdc   : > { %1407 = vmatprep.subr.mxu1 %v1621_v1  ;;  %1364 = vmatprep.subr.mxu0 %v1621_v1  ;;  %vm918_vm2 = vcmp.eq.s32.totalorder %v1931_v39, %v917_v23 }
  0xdd   : > { %1408 = vmatpush3.msra.mxu1 %v1803_v46  ;;  %1365 = vmatpush3.msra.mxu0 %v383_v32  ;;  %v1107_v29 = vsel %vm918_vm2, 1.0, %v1621_v1 }
  0xde   : > { %1409 = vmatprep.subr.mxu1 %v1621_v1  ;;  %1366 = vmatprep.subr.mxu0 %v1621_v1 }
  0xdf   : > { %1410 = vmatpush3.msra.mxu1 %v1806_v47  ;;  %1367 = vmatpush3.msra.mxu0 %v390_v34 }
  0xe0   : > { %1411 = vmatprep.subr.mxu1 %v1621_v1  ;;  %1368 = vmatprep.subr.mxu0 %v1621_v1 }
  0xe1   : > { %1412 = vmatpush3.msra.mxu1 %v1814_v50  ;;  %1369 = vmatpush3.msra.mxu0 %v397_v42 }
  0xe2   : > { %1413 = vmatprep.subr.mxu1 %v1621_v1  ;;  %1370 = vmatprep.subr.mxu0 %v1621_v1 }
  0xe3   : > { %1414 = vmatpush3.msra.mxu1 %v1823_v55  ;;  %1371 = vmatpush3.msra.mxu0 %v404_v49  ;;  %v926_v49 = vstv %s1106_s29 }
  0xe4   : > { %1415 = vmatprep.subr.mxu1 %v1621_v1  ;;  %1372 = vmatprep.subr.mxu0 %v1621_v1 }
  0xe5   : > { %1416 = vmatpush3.msra.mxu1 %v1835_v61  ;;  %1373 = vmatpush3.msra.mxu0 %v411_v59 }
  0xe6   : > { %1417 = vmatprep.subr.mxu1 %v1621_v1  ;;  %1374 = vmatprep.subr.mxu0 %v1621_v1 }
  0xe7   : > { %1418 = vmatpush3.msra.mxu1 %v1847_v4  ;;  %1375 = vmatpush3.msra.mxu0 %v418_v2 }
  0xe8   : > { %1419 = vmatprep.subr.mxu1 %v1621_v1  ;;  %1376 = vmatprep.subr.mxu0 %v1621_v1 }
  0xe9   : > { %1420 = vmatpush3.msra.mxu1 %v1859_v15  ;;  %1377 = vmatpush3.msra.mxu0 %v425_v13 }
  0xea   : > { %1421 = vmatprep.subr.mxu1 %v1621_v1  ;;  %1378 = vmatprep.subr.mxu0 %v1621_v1 }
  0xeb   : > { %1422 = vmatpush3.msra.mxu1 %v1871_v37  ;;  %1423 = vmatprep.mubr.msk.f32.mxu1 %vm1622_vm0, %v1621_v1 }
  0xec   : > { %1379 = vmatpush3.msra.mxu0 %v432_v33  ;;  %1424 = vmatmul.mubr.msk.f32.vlgmr.msra.gmra.mxu1 %vm242_vm1, %v1623_v51 }
  0xed   : > { %1380 = vmatprep.subr.mxu0 %v1621_v1  ;;  %1388 = vmatprep.mubr.msk.f32.mxu0 %vm1622_vm0, %v1621_v1 }
  0xee   : > { %1381 = vmatpush3.msra.mxu0 %v439_v40 }
  0xef   : > { %1382 = vmatprep.subr.mxu0 %v1621_v1 }
  0xf0   : > { %1383 = vmatpush3.msra.mxu0 %v446_v45 }
  0xf1   : > { %1384 = vmatprep.subr.mxu0 %v1621_v1 }
  0xf2   : > { %1385 = vmatpush3.msra.mxu0 %v453_v56 }
  0xf3   : > { %1386 = vmatprep.subr.mxu0 %v1621_v1  ;;  %v925_v1 = vshrl.u32 %v236_v38, 7 }
  0xf4   : > { %1387 = vmatpush3.msra.mxu0 %v460_v62 }
  0xf5   : > { %1389 = vmatmul.mubr.msk.f32.vlgmr.msra.gmra.mxu0 %vm242_vm1, %v1623_v51  ;;  %v927_v53 = vadd.s32 %v926_v49, %v925_v1 }
  0xf7   : > { %vm928_vm3 = vcmp.lt.s32.totalorder %v927_v53, 16 }
 0x16a   : > { %v499_v5 = vpop.f32.mrf.mxu1 }
 0x16c   : > { %v1285_v6 = vpop.f32.mrf.mxu1 }
 0x173   : > { %v348_v10 = vpop.f32.mrf.mxu0 }
 0x174   : > { %v500_v20 = vadd.f32 %v499_v5, %v348_v10 }
 0x175   : > { %v1250_v11 = vpop.f32.mrf.mxu0 }
 0x18a   : > { %v692_v12 = vpop.f32.mrf.mxu1 }
 0x18c   : > { %v1355_v16 = vpop.f32.mrf.mxu1 }
 0x194   : > { %v603_v17 = vpop.f32.mrf.mxu0 }
 0x195   : > { %v604_v22 = vadd.f32 %v603_v17, %v500_v20 }
 0x196   : > { %v1320_v18 = vpop.f32.mrf.mxu0 }
 0x197   : > { %v693_v24 = vadd.f32 %v692_v12, %v604_v22 }
 0x1ac   : > { %v898_v19 = vpop.f32.mrf.mxu1 }
 0x1ae   : > { %v1425_v21 = vpop.f32.mrf.mxu1 }
 0x1b5   : > { %v811_v25 = vpop.f32.mrf.mxu0 }
 0x1b6   : > { %v812_v26 = vadd.f32 %v811_v25, %v693_v24 }
 0x1b7   : > { %v1390_v27 = vpop.f32.mrf.mxu0 }
 0x1b8   : > { %v899_v28 = vadd.f32 %v898_v19, %v812_v26 }
 0x1ba   : > { %904 = vmax.xlane.f32.xlu0 %v899_v28  ;;  %902 = vst [vmem:[%s2116_s28] sm:$0xff] %v899_v28  ;;  %v921_v32 = vmul.f32 %v1107_v29, %v899_v28 }
 0x1be   : > { %922 = vadd.xlane.f32.xlu0 %v921_v32 }
 0x243   : > { %v905_v34 = vpop.xlane.xlu0 %904 }
 0x244   : > { %v906_v35 = vsub.f32 %v899_v28, %v905_v34 }
 0x246   : > { %v907_v42 = vmul.f32 1.442695, %v906_v35 }
 0x247   : > { %v923_v59 = vpop.xlane.xlu0 %922 }
 0x248   : > { %1491 = vpow2.f32 %v907_v42 }
 0x255   : > { %v1492_v46 = vpop.eup %1491 }
 0x256   : > { %909 = vadd.xlane.f32.xlu1 %v1492_v46 }
 0x2df   : > { %v910_v47 = vpop.xlane.xlu1 %909 }
 0x2e0   : > { %1493 = vlog2.f32 %v910_v47 }
 0x2ed   : > { %v1494_v50 = vpop.eup %1493 }
 0x2ee   : > { %v912_v54 = vmul.f32 0.6931472, %v1494_v50 }
 0x2f0   : > { %v913_v55 = vadd.f32 %v912_v54, %v905_v34 }
 0x2f2   : > { %v929_v60 = vsub.f32 %v913_v55, %v923_v59 }
 0x2f4   : > { %v930_v61 = vsel %vm928_vm3, %v929_v60, 0.0 }
 0x2f5   : > { %v932_v2 = vsel %vm931_vm4, %v930_v61, 0.0 }
 0x2f6   : > { %933 = vadd.xlane.f32.xlu0 %v932_v2 }
 0x2f7   : > { %1534 = shalt.err (!%p1531_p0)
}
 0x2f8   : > { %s1535_s14 = scalar_lea.hbm %s962_s7, 128  ;;  %s1539_s28 = scalar_lea.hbm %s2187_s3, 256 }
 0x2f9   : > { %p1536_p1 = scmp.ne.s32.totalorder %s962_s7, %s1535_s14  ;;  %p1540_p4 = scmp.lt.s32.totalorder %s962_s7, %s2187_s3 }
 0x2fa   : > { %p1541_p7 = scmp.lt.s32.totalorder %s1539_s28, %s1535_s14 }
 0x2fb   : > { %p1537_p2 = pnand %p1536_p1, %p1689_p5 }
 0x2fc   : > { %p1542_p8 = por %p1541_p7, %p1540_p4 }
 0x2fd   : > { %p1538_p3 = pneg %p1537_p2 }
 0x2ff   : > { %p1543_p6 = pnand %p1542_p8, %p1538_p3 }
 0x301   : > { %1546 = shalt.err (!%p1543_p6)
}
 0x302   : > { %1432 = dma.vmem_to_hbm [thread:$0]  (%p1689_p5), %s965_s8, 128, %s962_s7, %s946_s9  }
 0x303   : > { %s227_s6 = scalar_lea.vmem [#allocation6], %s1098_s27  ;;  %s975_s9 = scalar_lea.hbm %s2188_s4, %s1110_s30 }
 0x304   : > { %s977_s10 = sshll.u32 %s227_s6, 4  ;;  %s951_s12 = scalar_lea.sflag [#allocation7], %s2109_s23  ;;  %s2143_s10 = int_to_ptr.vmem [resolvable:$true] %s977_s10 }
 0x305   : > { %s1547_s13 = scalar_lea.vmem %s2143_s10, 128  ;;  %s1625_s27 = smov [#allocation6]  }
 0x306   : > { %p1548_p9 = scmp.ne.s32.totalorder %s2143_s10, %s1547_s13  ;;  %s1551_s14 = sshll.u32 %s1625_s27, 4  ;;  %s1552_s14 = int_to_ptr.vmem [resolvable:$false] %s1551_s14 }
 0x307   : > { %s1553_s20 = scalar_lea.vmem %s1552_s14, 256  ;;  %p1554_p12 = scmp.lt.s32.totalorder %s2143_s10, %s1552_s14 }
 0x308   : > { %p1549_p10 = pnand %p1548_p9, %p1689_p5  ;;  %p1555_p13 = scmp.lt.s32.totalorder %s1553_s20, %s1547_s13 }
 0x30a   : > { %p1550_p11 = pneg %p1549_p10  ;;  %p1556_p0 = por %p1555_p13, %p1554_p12 }
 0x30c   : > { %p1557_p1 = pnand %p1556_p0, %p1550_p11 }
 0x37f   : > { %v934_v3 = vpop.xlane.xlu0 %933 }
 0x380   : > { %v935_v4 = vrot.slane %v934_v3, 4 }
 0x382   : > { %v936_v13 = vadd.f32 %v935_v4, %v934_v3 }
 0x384   : > { %v937_v14 = vrot.slane %v936_v13, 2 }
 0x386   : > { %v938_v15 = vadd.f32 %v937_v14, %v936_v13 }
 0x388   : > { %v939_v33 = vrot.slane %v938_v15, 1 }
 0x38a   : > { %v940_v36 = vadd.f32 %v939_v33, %v938_v15 }
 0x38c   : > { %1426 = vpush %v940_v36 }
 0x3bd   : > { %s1427_s11 = spop %1426 }
 0x3be   : > { %v942_v37 = vstv %s1427_s11 }
 0x3bf   : > { %944 = vst [vmem:[%s227_s6] sm:$0xff] %v942_v37 }
 0x3c0   : > { %1560 = shalt.err (!%p1557_p1)
}
 0x3c1   : > { %s1561_s19 = scalar_lea.hbm %s975_s9, 128  ;;  %s1565_s22 = scalar_lea.hbm %s2188_s4, 256 }
 0x3c2   : > { %p1562_p2 = scmp.ne.s32.totalorder %s975_s9, %s1561_s19  ;;  %p1566_p7 = scmp.lt.s32.totalorder %s975_s9, %s2188_s4 }
 0x3c3   : > { %p1567_p8 = scmp.lt.s32.totalorder %s1565_s22, %s1561_s19 }
 0x3c4   : > { %p1563_p3 = pnand %p1562_p2, %p1689_p5 }
 0x3c5   : > { %p1568_p6 = por %p1567_p8, %p1566_p7 }
 0x3c6   : > { %p1564_p4 = pneg %p1563_p3 }
 0x3c8   : > { %p1569_p9 = pnand %p1568_p6, %p1564_p4 }
 0x3ca   : > { %1572 = shalt.err (!%p1569_p9)
}
 0x3cb   : > { %1433 = dma.vmem_to_hbm [thread:$0]  (%p1689_p5), %s2143_s10, 128, %s975_s9, %s951_s12  }
 0x3cc PF: > { %p1449_p10 = scmp.ge.s32.totalorder %s1615_s18, 2  ;;  %s989_s5 = sand.u32 1, %s1603_s15  }
 0x3cd   : > { %p2192_p11 = scmp.ne.s32.totalorder %s2190_s26, 0  ;;  %s990_s6 = scalar_lea.sflag [#allocation4], %s989_s5 }
 0x3cf   : > { %p1441_p12 = pnand %p1449_p10, %p2192_p11 }
 0x3d1   : > { %p1442_p13 = pneg %p1441_p12 }
 0x3d3   : > { %1594 = dma.done.wait (%p1442_p13), %s990_s6, 128  }
 0x3d4   : > { %1596 = vsyncadd (%p1442_p13), %s990_s6, 4294967168  ;;  %s999_s11 = scalar_lea.sflag [#allocation7], %s989_s5 }
 0x3d5   : > { %1598 = dma.done.wait (%p1442_p13), %s999_s11, 128  }
 0x3d6   : > { %1600 = vsyncadd (%p1442_p13), %s999_s11, 4294967168  ;;  %p19_p5 = scmp.ge.s32.totalorder %s1676_s21, 4   ;;  %s2193_s15 = smov %s1607_s16 }
 0x3d7   : > { %s2194_s16 = smov %s1611_s17  ;;  %s2195_s17 = smov %s1687_s24 }
 0x3d8   : > { %s2196_s18 = smov %s1676_s21  ;;  %21 = sbr.rel (!%p19_p5) target bundleno = 6 (0x6), region = 92 }
 0x3dd   :  { %1004 = vsyncpa [#allocation3], 1 }
 0x3de   :  { %1006 = vsyncpa [#allocation3 + $0x1], 1 }
 0x3df   :  { %1007 = vsyncpa [#allocation4], 1 }
 0x3e0   :  { %1009 = vsyncpa [#allocation4 + $0x1], 1 }
 0x3e1   :  { %1010 = vsyncpa [#allocation7], 1 }
 0x3e2   :  { %1012 = vsyncpa [#allocation7 + $0x1], 1 }

</bundles_post_ra>
